<compile_context>
chip_gen: v5e
topology: v5e:2x2
jax: 0.10.0
libtpu: 0.0.40
codegen_flags: <defaults>
</compile_context>

<pallas_src>
import jax
import jax.numpy as jnp
from jax import lax
from jax.experimental import pallas as pl
from jax.experimental.pallas import tpu as pltpu
import numpy as np

# ----------------------------- config (cfg.*) ------------------------------
NUM_LAYERS = 2
HIDDEN_DIM = 32
NODE_FEATURE_DIM = 4
BATCH_SIZE = 2
NUM_NODES_PER_GRAPH = 8          # cfg.dataset.num_nodes (mlp input width)
N_TOTAL = BATCH_SIZE * NUM_NODES_PER_GRAPH
NUM_EDGES = 8


def _round_up(v, m):
    return (v + m - 1) // m * m


# ---- packed weight-slab layout (rows of a [SLAB_ROWS, HIDDEN_DIM] f32 slab) ----
# 8-row-aligned offsets so every in-kernel slice starts on a sublane-tile boundary.
OFF_W0 = 0                                                  # w0t: [F, hidden]
OFF_B0 = _round_up(OFF_W0 + NODE_FEATURE_DIM, 8)            # b0 : [1, hidden]
OFF_W1 = _round_up(OFF_B0 + 1, 8)                           # w1t: [hidden, hidden]
OFF_B1 = _round_up(OFF_W1 + HIDDEN_DIM, 8)                  # b1 : [1, hidden]
OFF_WM = _round_up(OFF_B1 + 1, 8)                           # wmT: [B, N] (block-diag mlp)
OFF_BM = _round_up(OFF_WM + BATCH_SIZE, 8)                  # bm : scalar at [OFF_BM, 0]
SLAB_ROWS = _round_up(OFF_BM + 1, 8)


# ------------------------------ Pallas kernel ------------------------------
def hgnn_kernel(H_ref, x_ref, w_ref, out_ref):
    """Fused forward: 2 HGNN layers + ReLU + (folded) attention + mlp."""
    H = H_ref[...]                    # [N, E]
    x = x_ref[...]                    # [N, F]
    W = w_ref[...]                    # [SLAB_ROWS, hidden] packed weights

    # static slices out of the packed slab
    w0t = W[OFF_W0:OFF_W0 + NODE_FEATURE_DIM, :]            # [F, hidden]
    b0 = W[OFF_B0:OFF_B0 + 1, :]                            # [1, hidden]
    w1t = W[OFF_W1:OFF_W1 + HIDDEN_DIM, :]                  # [hidden, hidden]
    b1 = W[OFF_B1:OFF_B1 + 1, :]                            # [1, hidden]
    wmT = W[OFF_WM:OFF_WM + BATCH_SIZE, 0:N_TOTAL]          # [B, N] block-diag mlp weight
    bm = W[OFF_BM:OFF_BM + 1, 0:1]                          # [1, 1]

    # node degrees: nan_to_num(diag(sum(H,-1))^-0.5) ; edge degrees: ^-1
    dv = jnp.sum(H, axis=1, keepdims=True)                  # [N, 1]
    dv_inv = jnp.where(dv > 0.0, lax.rsqrt(dv), 0.0)        # d<=0 -> inf/nan -> 0
    de = jnp.sum(H, axis=0, keepdims=True)                  # [1, E]
    de_inv = jnp.where(de == 0.0, 0.0, 1.0 / de)

    # Fold the diagonal scalings into H once (hoisted out of both layers):
    #   Dv^-1/2 H De^-1 H^T Dv^-1/2 x  ==  P @ (A^T @ x)
    A = dv_inv * H                                          # Dv^-1/2 H          [N, E]
    P = A * de_inv                                          # Dv^-1/2 H De^-1    [N, E]

    def hgnn_layer(xin, wt, b):
        # A^T @ xin without materializing a transposed copy of H on the host.
        h = lax.dot_general(A, xin, (((0,), (0,)), ((), ())),
                            preferred_element_type=jnp.float32)      # [E, W_in]
        h = jnp.dot(P, h, preferred_element_type=jnp.float32)        # [N, W_in]
        return jnp.dot(h, wt, preferred_element_type=jnp.float32) + b  # Linear

    # num_layers == 2: layer0 -> ReLU -> layer1
    h = jnp.maximum(hgnn_layer(x, w0t, b0), 0.0)
    h = hgnn_layer(h, w1t, b1)                              # [N, hidden]

    # attention = softmax(Linear(hidden,1)(h), dim=1) over a singleton dim -> 1.0
    # exactly, so sum(att * h, dim=1) == sum(h, dim=1).  Fold it away and fuse
    # with the mlp:  y = wmT @ sum_j h[:, j] == sum_j (wmT @ h)[:, j]   (+ bm)
    z = jnp.dot(wmT, h, preferred_element_type=jnp.float32)  # [B, hidden]
    out_ref[...] = jnp.sum(z, axis=1, keepdims=True) + bm    # [B, 1]


# ------------------------------ host wrapper -------------------------------
def pack_params(params):
    """Pack all weights/biases into one [SLAB_ROWS, HIDDEN_DIM] f32 slab (1 DMA)."""
    assert N_TOTAL <= HIDDEN_DIM, "wmT must fit in the slab width"
    slab = jnp.zeros((SLAB_ROWS, HIDDEN_DIM), jnp.float32)
    slab = slab.at[OFF_W0:OFF_W0 + NODE_FEATURE_DIM, :].set(params["w0"].T)
    slab = slab.at[OFF_B0, :].set(params["b0"])
    slab = slab.at[OFF_W1:OFF_W1 + HIDDEN_DIM, :].set(params["w1"].T)
    slab = slab.at[OFF_B1, :].set(params["b1"])
    # block-diagonal expansion of the mlp weight so reshape(batch,-1) @ wm.T
    # becomes one matmul over the flat node axis
    wmT = jnp.kron(jnp.eye(BATCH_SIZE, dtype=jnp.float32), params["wm"])  # [B, N]
    slab = slab.at[OFF_WM:OFF_WM + BATCH_SIZE, 0:N_TOTAL].set(wmT)
    slab = slab.at[OFF_BM, 0].set(params["bm"][0])
    return slab


@jax.jit
def hgnn_forward(H, x, w_slab):
    vmem = pl.BlockSpec(memory_space=pltpu.MemorySpace.VMEM)
    return pl.pallas_call(
        hgnn_kernel,
        out_shape=jax.ShapeDtypeStruct((BATCH_SIZE, 1), jnp.float32),
        in_specs=[vmem, vmem, vmem],
        out_specs=vmem,
    )(H, x, w_slab)


# ----------------------------- pure-JAX reference --------------------------
def hgnn_reference(H, x, params):
    dv = jnp.sum(H, axis=1)
    dv_inv = jnp.where(dv > 0.0, dv ** -0.5, 0.0)[:, None]
    de = jnp.sum(H, axis=0)
    de_inv = jnp.where(de == 0.0, 0.0, 1.0 / de)[:, None]

    def layer(xin, w, b):
        h = dv_inv * xin
        h = H.T @ h
        h = de_inv * h
        h = H @ h
        h = dv_inv * h
        return h @ w.T + b

    h = layer(x, params["w0"], params["b0"])
    h = jnp.maximum(h, 0.0)
    h = layer(h, params["w1"], params["b1"])
    att = jax.nn.softmax(h @ params["wa"].T + params["ba"], axis=1)
    s = jnp.sum(att * h, axis=1)
    s = s.reshape(BATCH_SIZE, -1)
    return s @ params["wm"].T + params["bm"]


# ----------------------------------- main -----------------------------------
if __name__ == "__main__":
    key = jax.random.PRNGKey(0)
    k_h, k_x, k0, k1, k2, k3, k4, k5, k6, k7 = jax.random.split(key, 10)

    # deterministic synthetic hypergraph + parameters
    H = jax.random.bernoulli(k_h, 0.4, (N_TOTAL, NUM_EDGES)).astype(jnp.float32)
    x = jax.random.normal(k_x, (N_TOTAL, NODE_FEATURE_DIM), dtype=jnp.float32)

    params = {
        "w0": 0.2 * jax.random.normal(k0, (HIDDEN_DIM, NODE_FEATURE_DIM), jnp.float32),
        "b0": 0.1 * jax.random.normal(k1, (HIDDEN_DIM,), jnp.float32),
        "w1": 0.2 * jax.random.normal(k2, (HIDDEN_DIM, HIDDEN_DIM), jnp.float32),
        "b1": 0.1 * jax.random.normal(k3, (HIDDEN_DIM,), jnp.float32),
        "wa": 0.2 * jax.random.normal(k4, (1, HIDDEN_DIM), jnp.float32),
        "ba": 0.1 * jax.random.normal(k5, (1,), jnp.float32),
        "wm": 0.2 * jax.random.normal(k6, (1, NUM_NODES_PER_GRAPH), jnp.float32),
        "bm": 0.1 * jax.random.normal(k7, (1,), jnp.float32),
    }

    w_slab = pack_params(params)

    y_hat = hgnn_forward(H, x, w_slab)
    y_hat = jax.block_until_ready(y_hat)

    y_ref = hgnn_reference(H, x, params)   # full-fidelity reference incl. attention
    np.testing.assert_allclose(np.asarray(y_hat), np.asarray(y_ref),
                               rtol=1e-4, atol=1e-5)
    print("KERNEL_OK")
</pallas_src>

<mosaic_0001>
module attributes {stable_mosaic.version = 11 : i64} {
  func.func @hgnn_kernel(%arg0: memref<16x8xf32, #tpu.memory_space<vmem>>, %arg1: memref<16x4xf32, #tpu.memory_space<vmem>>, %arg2: memref<72x32xf32, #tpu.memory_space<vmem>>, %arg3: memref<2x1xf32, #tpu.memory_space<vmem>>) attributes {dimension_semantics = [], scalar_prefetch = 0 : i64, scratch_operands = 0 : i64, tpu.core_type = #tpu.core_type<tc>} {
    %c0 = arith.constant 0 : index
    %c0_0 = arith.constant 0 : index
    %0 = vector.load %arg0[%c0, %c0_0] : memref<16x8xf32, #tpu.memory_space<vmem>>, vector<16x8xf32>
    %c0_1 = arith.constant 0 : index
    %c0_2 = arith.constant 0 : index
    %1 = vector.load %arg1[%c0_1, %c0_2] : memref<16x4xf32, #tpu.memory_space<vmem>>, vector<16x4xf32>
    %c0_3 = arith.constant 0 : index
    %c0_4 = arith.constant 0 : index
    %2 = vector.load %arg2[%c0_3, %c0_4] : memref<72x32xf32, #tpu.memory_space<vmem>>, vector<72x32xf32>
    %3 = vector.extract_strided_slice %2 {offsets = [0, 0], sizes = [4, 32], strides = [1, 1]} : vector<72x32xf32> to vector<4x32xf32>
    %4 = vector.extract_strided_slice %2 {offsets = [8, 0], sizes = [1, 32], strides = [1, 1]} : vector<72x32xf32> to vector<1x32xf32>
    %5 = vector.extract_strided_slice %2 {offsets = [16, 0], sizes = [32, 32], strides = [1, 1]} : vector<72x32xf32> to vector<32x32xf32>
    %6 = vector.extract_strided_slice %2 {offsets = [48, 0], sizes = [1, 32], strides = [1, 1]} : vector<72x32xf32> to vector<1x32xf32>
    %7 = vector.extract_strided_slice %2 {offsets = [56, 0], sizes = [2, 16], strides = [1, 1]} : vector<72x32xf32> to vector<2x16xf32>
    %8 = vector.extract_strided_slice %2 {offsets = [64, 0], sizes = [1, 1], strides = [1, 1]} : vector<72x32xf32> to vector<1x1xf32>
    %cst = arith.constant dense<0.000000e+00> : vector<16xf32>
    %9 = vector.multi_reduction <add>, %0, %cst [1] : vector<16x8xf32> to vector<16xf32>
    %10 = vector.shape_cast %9 : vector<16xf32> to vector<16x1xf32>
    %cst_5 = arith.constant 0.000000e+00 : f32
    %11 = vector.broadcast %cst_5 : f32 to vector<16x1xf32>
    %12 = arith.cmpf ogt, %10, %11 : vector<16x1xf32>
    %13 = math.rsqrt %10 : vector<16x1xf32>
    %cst_6 = arith.constant 0.000000e+00 : f32
    %14 = vector.broadcast %cst_6 : f32 to vector<16x1xf32>
    %15 = arith.select %12, %13, %14 : vector<16x1xi1>, vector<16x1xf32>
    %cst_7 = arith.constant dense<0.000000e+00> : vector<8xf32>
    %16 = vector.multi_reduction <add>, %0, %cst_7 [0] : vector<16x8xf32> to vector<8xf32>
    %17 = vector.shape_cast %16 : vector<8xf32> to vector<1x8xf32>
    %cst_8 = arith.constant 0.000000e+00 : f32
    %18 = vector.broadcast %cst_8 : f32 to vector<1x8xf32>
    %19 = arith.cmpf oeq, %17, %18 : vector<1x8xf32>
    %cst_9 = arith.constant 1.000000e+00 : f32
    %20 = vector.broadcast %cst_9 : f32 to vector<1x8xf32>
    %21 = arith.divf %20, %17 : vector<1x8xf32>
    %cst_10 = arith.constant 0.000000e+00 : f32
    %22 = vector.broadcast %cst_10 : f32 to vector<1x8xf32>
    %23 = arith.select %19, %22, %21 : vector<1x8xi1>, vector<1x8xf32>
    %24 = vector.broadcast %15 : vector<16x1xf32> to vector<16x8xf32>
    %25 = arith.mulf %24, %0 : vector<16x8xf32>
    %26 = vector.broadcast %23 : vector<1x8xf32> to vector<16x8xf32>
    %27 = arith.mulf %25, %26 : vector<16x8xf32>
    %cst_11 = arith.constant dense<0.000000e+00> : vector<8x4xf32>
    %28 = tpu.matmul %25, %1, %cst_11 {dimension_numbers = #tpu.dot_dimension_numbers<[0], [0], [1], [1], [0, 1, 1, 1], [], []>} : vector<16x8xf32>, vector<16x4xf32>, vector<8x4xf32> -> vector<8x4xf32>
    %cst_12 = arith.constant dense<0.000000e+00> : vector<16x4xf32>
    %29 = tpu.matmul %27, %28, %cst_12 {dimension_numbers = #tpu.dot_dimension_numbers<[1], [0], [0], [1], [0, 0, 1, 1], [], []>} : vector<16x8xf32>, vector<8x4xf32>, vector<16x4xf32> -> vector<16x4xf32>
    %cst_13 = arith.constant dense<0.000000e+00> : vector<16x32xf32>
    %30 = tpu.matmul %29, %3, %cst_13 {dimension_numbers = #tpu.dot_dimension_numbers<[1], [0], [0], [1], [0, 0, 1, 1], [], []>} : vector<16x4xf32>, vector<4x32xf32>, vector<16x32xf32> -> vector<16x32xf32>
    %31 = vector.broadcast %4 : vector<1x32xf32> to vector<16x32xf32>
    %32 = arith.addf %30, %31 : vector<16x32xf32>
    %cst_14 = arith.constant 0.000000e+00 : f32
    %33 = vector.broadcast %cst_14 : f32 to vector<16x32xf32>
    %34 = arith.maximumf %32, %33 : vector<16x32xf32>
    %cst_15 = arith.constant dense<0.000000e+00> : vector<8x32xf32>
    %35 = tpu.matmul %25, %34, %cst_15 {dimension_numbers = #tpu.dot_dimension_numbers<[0], [0], [1], [1], [0, 1, 1, 1], [], []>} : vector<16x8xf32>, vector<16x32xf32>, vector<8x32xf32> -> vector<8x32xf32>
    %cst_16 = arith.constant dense<0.000000e+00> : vector<16x32xf32>
    %36 = tpu.matmul %27, %35, %cst_16 {dimension_numbers = #tpu.dot_dimension_numbers<[1], [0], [0], [1], [0, 0, 1, 1], [], []>} : vector<16x8xf32>, vector<8x32xf32>, vector<16x32xf32> -> vector<16x32xf32>
    %cst_17 = arith.constant dense<0.000000e+00> : vector<16x32xf32>
    %37 = tpu.matmul %36, %5, %cst_17 {dimension_numbers = #tpu.dot_dimension_numbers<[1], [0], [0], [1], [0, 0, 1, 1], [], []>} : vector<16x32xf32>, vector<32x32xf32>, vector<16x32xf32> -> vector<16x32xf32>
    %38 = vector.broadcast %6 : vector<1x32xf32> to vector<16x32xf32>
    %39 = arith.addf %37, %38 : vector<16x32xf32>
    %cst_18 = arith.constant dense<0.000000e+00> : vector<2x32xf32>
    %40 = tpu.matmul %7, %39, %cst_18 {dimension_numbers = #tpu.dot_dimension_numbers<[1], [0], [0], [1], [0, 0, 1, 1], [], []>} : vector<2x16xf32>, vector<16x32xf32>, vector<2x32xf32> -> vector<2x32xf32>
    %cst_19 = arith.constant dense<0.000000e+00> : vector<2xf32>
    %41 = vector.multi_reduction <add>, %40, %cst_19 [1] : vector<2x32xf32> to vector<2xf32>
    %42 = vector.shape_cast %41 : vector<2xf32> to vector<2x1xf32>
    %43 = vector.broadcast %8 : vector<1x1xf32> to vector<2x1xf32>
    %44 = arith.addf %42, %43 : vector<2x1xf32>
    %c0_20 = arith.constant 0 : index
    %c0_21 = arith.constant 0 : index
    %45 = vector.load %arg3[%c0_20, %c0_21] : memref<2x1xf32, #tpu.memory_space<vmem>>, vector<2x1xf32>
    tpu.vector_store %arg3[%c0_20, %c0_21], %44 {strides = array<i32>} : memref<2x1xf32, #tpu.memory_space<vmem>>, vector<2x1xf32>,
    return
  }
}

</mosaic_0001>

<bundles_post_ra>
// kernel: hgnn_forward.1
= control target key start
LH: loop header
LB: loop body
LE: loop exit
PB: predicated region body
PF: predicated region fallthrough
CT: control target
= control target key end

     0   :  { %vm27_vm0 = vcmask 64512   ;;  %vm118_vm14 = vcmask 130048   ;;  %vm179_vm15 = vcmask 1043456   ;;  %s412_s0 = inlined_call_operand.vmem [shape: f32[16,8], index: 0, kind: input, shape index: {}]   ;;  %s413_s1 = inlined_call_operand.vmem [shape: f32[16,4], index: 1, kind: input, shape index: {}]   ;;  %s414_s2 = inlined_call_operand.vmem [shape: f32[72,32], index: 2, kind: input, shape index: {}]   ;;  %s415_s3 = inlined_call_operand.vmem [shape: f32[2,1], index: 3, kind: output, shape index: {}]  }
   0x1   :  { %v14_v0 = vld [vmem:[%s412_s0] sm:$0xff]  ;;  %v363_v1 = vld [vmem:[%s412_s0 + $0x8] sm:$0xff]  ;;  %v21_v61 = vld [vmem:[%s414_s2 + $0x18] sm:$0xff] }
   0x2   :  { %v28_v2 = vsel %vm27_vm0, %v14_v0, 0.0  ;;  %v31_v3 = vsel %vm27_vm0, %v363_v1, 0.0  ;;  %v17_v13 = vld [vmem:[%s413_s1 + $0x8] sm:$0xff]  ;;  %v16_v14 = vld [vmem:[%s413_s1] sm:$0xff]  ;;  %v20_v63 = vld [vmem:[%s414_s2 + $0x10] sm:$0xff] }
   0x3   :  { %29 = vadd.xlane.f32.xlu0 %v28_v2  ;;  %v58_v4 = vadd.f32 %v31_v3, %v28_v2  ;;  %136 = vmatpush.msra.mxu0 %v17_v13  ;;  %v18_v48 = vld [vmem:[%s414_s2] sm:$0xff]  ;;  %v19_v52 = vld [vmem:[%s414_s2 + $0x8] sm:$0xff] }
   0x4   :  { %320 = vmatpush.msk.msra.mxu2 %vm179_vm15, %v18_v48  ;;  %v171_v53 = vperm.slane %v19_v52, 0  ;;  %v23_v59 = vld [vmem:[%s414_s2 + $0x28] sm:$0xff]  ;;  %v22_v60 = vld [vmem:[%s414_s2 + $0x20] sm:$0xff] }
   0x5   :  { %v59_v5 = vrot.slane %v58_v4, 4  ;;  %137 = vmatpush.msra.mxu0 %v16_v14 }
   0x7   :  { %v60_v6 = vadd.f32 %v59_v5, %v58_v4 }
   0x9   :  { %v61_v7 = vrot.slane %v60_v6, 2 }
   0xb   :  { %32 = vadd.xlane.f32.xlu0 %v31_v3  ;;  %v62_v8 = vadd.f32 %v61_v7, %v60_v6  ;;  %v24_v3 = vld [vmem:[%s414_s2 + $0x30] sm:$0xff] }
   0xc   :  { %v251_v4 = vperm.slane %v24_v3, 0 }
   0xd   :  { %v63_v9 = vrot.slane %v62_v8, 1 }
   0xf   :  { %v64_v10 = vadd.f32 %v63_v9, %v62_v8  ;;  %v25_v8 = vld [vmem:[%s414_s2 + $0x38] sm:$0xff] }
  0x11   :  { %331 = vrcp.f32 %v64_v10  ;;  %vm71_vm1 = vweird.f32 %v64_v10  ;;  %v77_v21 = vand.u32 2147483648, %v64_v10  ;;  %v75_v23 = vand.u32 2147483647, %v64_v10 }
  0x12   :  { %vm65_vm6 = vcmp.eq.f32.partialorder %v64_v10, 0.0 }
  0x13   :  { %v78_v26 = vor.u32 1.1754944e-38, %v77_v21  ;;  %vm76_vm4 = vcmp.eq.f32.partialorder %v75_v23, 8.507059e+37 }
  0x17   :  { %v332_v11 = vpop.eup %331 }
  0x18   :  { %v67_v12 = vmul.f32 %v332_v11, %v64_v10  ;;  %vm72_vm2 = vweird.f32 %v332_v11 }
  0x19   :  { %vm73_vm3 = vmor %vm71_vm1, %vm72_vm2  ;;  %vm172_vm1 = vcmask 31744   ;;  %vm252_vm2 = vcmask 261120  }
  0x1a   :  { %v68_v16 = vsub.f32 1.0, %v67_v12 }
  0x1c   :  { %v69_v17 = vmul.f32 %v332_v11, %v68_v16 }
  0x1e   :  { %v70_v22 = vadd.f32 %v332_v11, %v69_v17 }
  0x20   :  { %v74_v27 = vsel %vm73_vm3, %v332_v11, %v70_v22  ;;  %v26_v11 = vld [vmem:[%s414_s2 + $0x40] sm:$0xff]  ;;  %vm311_vm3 = vcmask 1024  }
  0x21   :  { %v79_v32 = vsel %vm76_vm4, %v78_v26, %v74_v27  ;;  %v309_v12 = vperm.slane %v26_v11, 0 }
  0x22   :  { %v81_v36 = vsel %vm65_vm6, 0.0, %v79_v32 }
  0x76   :  { %v30_v15 = vpop.xlane.xlu0 %29 }
  0x77   :  { %333 = vrsqrt.f32 %v30_v15  ;;  %vm42_vm7 = vweird.f32 %v30_v15  ;;  %vm34_vm9 = vcmp.gt.f32.partialorder %v30_v15, 0.0 }
  0x7d   :  { %v334_v18 = vpop.eup %333 }
  0x7e   :  { %v37_v19 = vmul.f32 %v334_v18, %v30_v15  ;;  %v33_v20 = vpop.xlane.xlu0 %32  ;;  %vm43_vm5 = vweird.f32 %v334_v18 }
  0x7f   :  { %335 = vrsqrt.f32 %v33_v20  ;;  %vm44_vm8 = vmor %vm42_vm7, %vm43_vm5  ;;  %vm52_vm11 = vweird.f32 %v33_v20  ;;  %vm35_vm13 = vcmp.gt.f32.partialorder %v33_v20, 0.0 }
  0x80   :  { %v38_v24 = vmul.f32 %v334_v18, %v37_v19 }
  0x82   :  { %v39_v25 = vmul.f32 0.5, %v38_v24 }
  0x84   :  { %v40_v28 = vsub.f32 1.5, %v39_v25 }
  0x85   :  { %v336_v29 = vpop.eup %335 }
  0x86   :  { %v47_v30 = vmul.f32 %v336_v29, %v33_v20  ;;  %v41_v31 = vmul.f32 %v334_v18, %v40_v28  ;;  %vm53_vm10 = vweird.f32 %v336_v29 }
  0x87   :  { %vm54_vm12 = vmor %vm52_vm11, %vm53_vm10 }
  0x88   :  { %v48_v33 = vmul.f32 %v336_v29, %v47_v30  ;;  %v45_v34 = vsel %vm44_vm8, %v334_v18, %v41_v31 }
  0x89   :  { %v56_v35 = vsel %vm34_vm9, %v45_v34, 0.0 }
  0x8a   :  { %v49_v37 = vmul.f32 0.5, %v48_v33  ;;  %v82_v38 = vmul.f32 %v56_v35, %v14_v0 }
  0x8c   :  { %v50_v39 = vsub.f32 1.5, %v49_v37  ;;  %86 = vxpose.xlu1.b32.start [1/2] (short) (narrow) %v82_v38, 8  ;;  %v84_v40 = vmul.f32 %v82_v38, %v81_v36 }
  0x8e   :  { %v51_v41 = vmul.f32 %v336_v29, %v50_v39 }
  0x90   :  { %v55_v42 = vsel %vm54_vm12, %v336_v29, %v51_v41 }
  0x91   :  { %v57_v43 = vsel %vm35_vm13, %v55_v42, 0.0 }
  0x92   :  { %v83_v44 = vmul.f32 %v57_v43, %v363_v1 }
  0x94   :  { %87 = vxpose.xlu1.b32.end [2/2] (short) (narrow) %v83_v44, 8  ;;  %v85_v45 = vmul.f32 %v83_v44, %v81_v36 }
 0x130   :  { %v102_v46 = vpop.trf.xlu1 }
 0x131   :  { %317 = vmatmul.msk.f32.vlgmr.msra.gmra.mxu0 %vm118_vm14, %v102_v46 }
 0x1ae   :  { %v139_v47 = vpop.f32.mrf.mxu0 }
 0x1af   :  { %163 = vmatpush.msra.mxu1 %v139_v47 }
 0x1b0   :  { %318 = vmatmul.msk.f32.vlgmr.msra.gmra.mxu1 %vm27_vm0, %v84_v40 }
 0x1b8   :  { %319 = vmatmul.msk.f32.gmra.mxu1 %vm27_vm0, %v85_v45 }
 0x22d   :  { %v165_v49 = vpop.f32.mrf.mxu1 }
 0x22e   :  { %321 = vmatmul.msk.f32.vlgmr.msra.gmra.mxu2 %vm172_vm1, %v165_v49 }
 0x235   :  { %v168_v50 = vpop.f32.mrf.mxu1 }
 0x236   :  { %322 = vmatmul.msk.f32.gmra.mxu2 %vm172_vm1, %v168_v50 }
 0x2b1   :  { %v200_v51 = vpop.f32.mrf.mxu2 }
 0x2b2   :  { %v201_v55 = vadd.f32 %v200_v51, %v171_v53 }
 0x2b4   :  { %v206_v58 = vmax.f32 %v201_v55, 0.0 }
 0x2b9   :  { %v203_v54 = vpop.f32.mrf.mxu2 }
 0x2ba   :  { %v204_v56 = vadd.f32 %v203_v54, %v171_v53 }
 0x2bc   :  { %v207_v57 = vmax.f32 %v204_v56, 0.0 }
 0x2be   :  { %222 = vmatpush.msra.mxu3 %v207_v57 }
 0x2c0   :  { %223 = vmatpush.msra.mxu3 %v206_v58 }
 0x2c1   :  { %323 = vmatmul.msk.f32.vlgmr.msra.gmra.mxu3 %vm118_vm14, %v102_v46 }
 0x2c2   :  { %271 = vmatpush.msrb.mxu3 %v23_v59 }
 0x2c4   :  { %272 = vmatpush.msrb.mxu3 %v22_v60 }
 0x2c6   :  { %273 = vmatpush.msrb.mxu3 %v21_v61 }
 0x2c8   :  { %274 = vmatpush.msrb.mxu3 %v20_v63 }
 0x344   :  { %v225_v62 = vpop.f32.mrf.mxu3 }
 0x345   :  { %243 = vmatpush.msrb.mxu0 %v225_v62  ;;  %329 = vmatpush.msrb.mxu2 %v225_v62 }
 0x346   :  { %324 = vmatmul.msk.f32.vlgmr.msrb.gmra.mxu0 %vm27_vm0, %v84_v40  ;;  %325 = vmatmul.msk.f32.vlgmr.msrb.gmra.mxu2 %vm27_vm0, %v85_v45  ;;  %vm305_vm0 = vcmask 254976  }
 0x3c3   :  { %v245_v0 = vpop.f32.mrf.mxu0 }
 0x3c4   :  { %326 = vmatmul.msk.f32.vlgmr.msrb.gmra.mxu3 %vm252_vm2, %v245_v0 }
 0x3c9   :  { %v248_v1 = vpop.f32.mrf.mxu2 }
 0x3cc   :  { %327 = vmatmul.msk.f32.gmra.mxu3 %vm252_vm2, %v248_v1 }
 0x447   :  { %v276_v2 = vpop.f32.mrf.mxu3 }
 0x448   :  { %v277_v7 = vadd.f32 %v276_v2, %v251_v4 }
 0x44f   :  { %v279_v5 = vpop.f32.mrf.mxu3 }
 0x450   :  { %v280_v6 = vadd.f32 %v279_v5, %v251_v4 }
 0x452   :  { %299 = vmatpush.msrb.mxu1 %v280_v6 }
 0x454   :  { %300 = vmatpush.msrb.mxu1 %v277_v7 }
 0x455   :  { %328 = vmatmul.msk.f32.vlgmr.msrb.gmra.mxu1 %vm118_vm14, %v25_v8 }
 0x4d2   :  { %v302_v9 = vpop.f32.mrf.mxu1 }
 0x4d3   :  { %v306_v10 = vsel %vm305_vm0, %v302_v9, 0.0 }
 0x4d4   :  { %307 = vadd.xlane.f32.xlu2 %v306_v10 }
 0x547   :  { %v308_v13 = vpop.xlane.xlu2 %307 }
 0x548   :  { %v310_v14 = vadd.f32 %v309_v12, %v308_v13 }
 0x54a   :  { %312 = vst.msk [vmem:[%s415_s3] sm:$0x3] %vm311_vm3, %v310_v14 }

</bundles_post_ra>
